<compile_context>
chip_gen: v7x
topology: tpu7x:2x2x1
jax: 0.10.0
libtpu: 0.0.40
codegen_flags: <defaults>
</compile_context>

<pallas_src>
import functools

import jax
import jax.numpy as jnp
from jax import lax
from jax.experimental import pallas as pl
from jax.experimental.pallas import tpu as pltpu

_EPS = 1e-10


def _round_up(x, m):
    return ((x + m - 1) // m) * m


def _cc_kernel(pred_ref, true_ref, r_ref, *, chunk, num_chunks):
    """Per-row Pearson correlation of the (normalized) saliency maps.

    pred_ref, true_ref : (Bt, HW) VMEM tiles in native dtype
    r_ref              : (Bt, 1) float32, per-row correlation coefficient
    """
    bt, hw = pred_ref.shape
    n = jnp.float32(hw)

    def chunk_stats(p, t):
        # p, t already f32; all 7 stats from the same loaded vregs (single pass).
        return (jnp.sum(p, axis=-1, keepdims=True),
                jnp.sum(t, axis=-1, keepdims=True),
                jnp.sum(p * p, axis=-1, keepdims=True),
                jnp.sum(t * t, axis=-1, keepdims=True),
                jnp.sum(t * p, axis=-1, keepdims=True),
                jnp.max(p, axis=-1, keepdims=True),
                jnp.min(p, axis=-1, keepdims=True))

    if num_chunks == 1:
        p = pred_ref[...].astype(jnp.float32)
        t = true_ref[...].astype(jnp.float32)
        s_p, s_t, s_pp, s_tt, s_tp, mx, mn = chunk_stats(p, t)
    else:
        def body(c, carry):
            s_p, s_t, s_pp, s_tt, s_tp, mx, mn = carry
            off = pl.multiple_of(c * chunk, chunk)  # chunk is a multiple of 128
            p = pred_ref[:, pl.ds(off, chunk)].astype(jnp.float32)
            t = true_ref[:, pl.ds(off, chunk)].astype(jnp.float32)
            cs = chunk_stats(p, t)
            return (s_p + cs[0], s_t + cs[1], s_pp + cs[2], s_tt + cs[3],
                    s_tp + cs[4],
                    jnp.maximum(mx, cs[5]), jnp.minimum(mn, cs[6]))

        zero = jnp.zeros((bt, 1), jnp.float32)
        init = (zero, zero, zero, zero, zero,
                jnp.full((bt, 1), -jnp.inf, jnp.float32),
                jnp.full((bt, 1), jnp.inf, jnp.float32))
        s_p, s_t, s_pp, s_tt, s_tp, mx, mn = lax.fori_loop(
            0, num_chunks, body, init, unroll=(num_chunks <= 8))

    # Fold the module's normalizations into scalars:
    #   pred_norm = A * p + Bc   (min-max, then /(sum+eps))
    #   true_norm = ct * t       (/(sum+eps))
    a = 1.0 / (mx - mn)          # no eps on (max - min), matching the module
    b = -mn * a
    sum_pn = a * s_p + b * n     # sum of min-max-normalized pred
    ct = 1.0 / (s_t + _EPS)
    cp = 1.0 / (sum_pn + _EPS)
    A = cp * a
    Bc = cp * b

    # Statistics of the normalized maps via the raw statistics.
    sum_x = ct * s_t
    sum_y = A * s_p + Bc * n
    sum_prod = ct * (A * s_tp + Bc * s_t)
    sum_x_sq = (ct * ct) * s_tt
    sum_y_sq = A * A * s_pp + 2.0 * (A * Bc) * s_p + (Bc * Bc) * n

    num = sum_prod - sum_x * sum_y / n
    den = jnp.sqrt((sum_x_sq - sum_x * sum_x / n) *
                   (sum_y_sq - sum_y * sum_y / n))
    # No guard on den == 0 (matches the PyTorch module's NaN/inf behavior for
    # degenerate rows; zero-padded batch rows hit this path and are sliced off
    # before the mean in the wrapper).
    r_ref[...] = num / den


def correlation_coefficient_loss(y_pred, y_true):
    """JAX/Pallas equivalent of Correlation_coefficient.forward."""
    # Glue mirrors torch.squeeze (removes all size-1 dims); requires B > 1, C == 1.
    y_pred = jnp.squeeze(y_pred)
    y_true = jnp.squeeze(y_true)
    assert y_pred.ndim == 3 and y_true.shape == y_pred.shape, \
        "expected (B, H, W) after squeeze"
    B, H, W = y_pred.shape
    HW = H * W

    # Lane-dense flatten; keep the native dtypes through the DMA.
    p2 = y_pred.reshape(B, HW)
    t2 = y_true.reshape(B, HW)

    # Generation-aware VMEM sizing (v7x has only 64 MiB/TC; v5e/v6e have 128 MiB).
    try:
        vmem_cap = int(pltpu.get_tpu_info().vmem_capacity_bytes)
    except Exception:
        vmem_cap = 64 * 1024 * 1024
    if vmem_cap >= 96 * 1024 * 1024:
        budget, vmem_limit = 48 * 1024 * 1024, 96 * 1024 * 1024
    else:
        budget, vmem_limit = 16 * 1024 * 1024, 48 * 1024 * 1024

    # Pad batch only up to a multiple of 8 (usually a no-op, at most 7 junk rows).
    B8 = _round_up(B, 8)
    if B8 != B:
        p2 = jnp.pad(p2, ((0, B8 - B), (0, 0)))
        t2 = jnp.pad(t2, ((0, B8 - B), (0, 0)))

    # Rows per grid step: largest multiple-of-8 divisor of B8 that fits the
    # budget (2 pipeline buffers x 2 inputs at native dtype), capped so the
    # chunked f32 temporaries stay small, and kept < B8 when possible so the
    # grid has >= 2 "parallel" steps (sharded across TensorCores on v7x).
    per_row = 2 * HW * (jnp.dtype(p2.dtype).itemsize + jnp.dtype(t2.dtype).itemsize)
    rows_budget = max(8, min(budget // max(per_row, 1), 512))
    m = B8 // 8
    divisors = [k for k in range(1, m + 1) if m % k == 0]
    feasible = [k for k in divisors if 8 * k <= rows_budget] or [1]
    if m >= 2:
        proper = [k for k in feasible if k < m]
        k = max(proper) if proper else max(feasible)
    else:
        k = max(feasible)
    bt = 8 * k
    nsteps = B8 // bt

    # Lane chunk for the fused in-kernel reduction loop: the largest multiple of
    # 128 that divides HW and is <= 1024; otherwise process the full row at once.
    chunk = HW
    if HW % 128 == 0:
        cands = [c for c in range(128, min(HW, 1024) + 1, 128) if HW % c == 0]
        if cands:
            chunk = max(cands)
    num_chunks = HW // chunk

    kernel = functools.partial(_cc_kernel, chunk=chunk, num_chunks=num_chunks)

    r = pl.pallas_call(
        kernel,
        out_shape=jax.ShapeDtypeStruct((B8, 1), jnp.float32),
        grid_spec=pltpu.PrefetchScalarGridSpec(
            num_scalar_prefetch=0,
            grid=(nsteps,),
            in_specs=[
                pl.BlockSpec((bt, HW), lambda i: (i, 0)),
                pl.BlockSpec((bt, HW), lambda i: (i, 0)),
            ],
            out_specs=pl.BlockSpec((bt, 1), lambda i: (i, 0)),
        ),
        compiler_params=pltpu.CompilerParams(
            # each grid step owns its own output rows -> fully parallel batch axis
            dimension_semantics=("parallel",),
            vmem_limit_bytes=vmem_limit,
        ),
    )(p2, t2)

    # loss = -mean_b r_b   (negate + mean in plain JAX, over the real rows only —
    # padded rows are NaN/inf by design and must stay sliced off).
    return -jnp.mean(r[:B, 0])


def _reference(y_pred, y_true):
    """Pure-JAX reference mirroring the PyTorch forward, for sanity checking."""
    y_pred = jnp.squeeze(y_pred).astype(jnp.float32)
    y_true = jnp.squeeze(y_true).astype(jnp.float32)
    H, W = y_pred.shape[1], y_pred.shape[2]
    max_p = jnp.max(y_pred, axis=(1, 2), keepdims=True)
    min_p = jnp.min(y_pred, axis=(1, 2), keepdims=True)
    y_pred = (y_pred - min_p) / (max_p - min_p)
    sum_t = jnp.sum(y_true, axis=(1, 2), keepdims=True)
    sum_p = jnp.sum(y_pred, axis=(1, 2), keepdims=True)
    y_true = y_true / (sum_t + _EPS)
    y_pred = y_pred / (sum_p + _EPS)
    N = H * W
    sum_prod = jnp.sum(y_true * y_pred, axis=(1, 2), keepdims=True)
    sum_x = jnp.sum(y_true, axis=(1, 2), keepdims=True)
    sum_y = jnp.sum(y_pred, axis=(1, 2), keepdims=True)
    sum_x_sq = jnp.sum(jnp.square(y_true), axis=(1, 2), keepdims=True)
    sum_y_sq = jnp.sum(jnp.square(y_pred), axis=(1, 2), keepdims=True)
    num = sum_prod - sum_x * sum_y / N
    den = jnp.sqrt((sum_x_sq - jnp.square(sum_x) / N) *
                   (sum_y_sq - jnp.square(sum_y) / N))
    return -1.0 * jnp.mean(num / den)


if __name__ == "__main__":
    key = jax.random.PRNGKey(0)

    # Case 1: small NCHW saliency-map-like inputs (single-chunk kernel path).
    k1, k2, k3, k4 = jax.random.split(key, 4)
    B, C, Hh, Ww = 2, 1, 16, 16
    y_pred = jax.nn.sigmoid(jax.random.normal(k1, (B, C, Hh, Ww), jnp.float32))
    y_true = jax.nn.sigmoid(jax.random.normal(k2, (B, C, Hh, Ww), jnp.float32))
    loss = jax.block_until_ready(correlation_coefficient_loss(y_pred, y_true))
    ref = jax.block_until_ready(_reference(y_pred, y_true))
    assert jnp.allclose(loss, ref, atol=5e-4, rtol=5e-4), (loss, ref)

    # Case 2: larger spatial size to exercise the fused chunked-reduction path.
    y_pred2 = jax.nn.sigmoid(jax.random.normal(k3, (2, 1, 64, 64), jnp.float32))
    y_true2 = jax.nn.sigmoid(jax.random.normal(k4, (2, 1, 64, 64), jnp.float32))
    loss2 = jax.block_until_ready(correlation_coefficient_loss(y_pred2, y_true2))
    ref2 = jax.block_until_ready(_reference(y_pred2, y_true2))
    assert jnp.allclose(loss2, ref2, atol=5e-4, rtol=5e-4), (loss2, ref2)

    print("KERNEL_OK")
</pallas_src>

<mosaic_0001>
module attributes {stable_mosaic.version = 11 : i64} {
  func.func @_cc_kernel(%arg0: i32, %arg1: memref<8x256xf32, #tpu.memory_space<vmem>>, %arg2: memref<8x256xf32, #tpu.memory_space<vmem>>, %arg3: memref<8x1xf32, #tpu.memory_space<vmem>>) attributes {dimension_semantics = [#tpu.dimension_semantics<parallel>], iteration_bounds = array<i64: 1>, scalar_prefetch = 0 : i64, scratch_operands = 0 : i64, tpu.core_type = #tpu.core_type<tc>, window_params = [{transform_indices = @transform_0, window_bounds = array<i64: 8, 256>}, {transform_indices = @transform_1, window_bounds = array<i64: 8, 256>}, {transform_indices = @transform_2, window_bounds = array<i64: 8, 1>}]} {
    %c0 = arith.constant 0 : index
    %c0_0 = arith.constant 0 : index
    %0 = vector.load %arg1[%c0, %c0_0] : memref<8x256xf32, #tpu.memory_space<vmem>>, vector<8x256xf32>
    %c0_1 = arith.constant 0 : index
    %c0_2 = arith.constant 0 : index
    %1 = vector.load %arg2[%c0_1, %c0_2] : memref<8x256xf32, #tpu.memory_space<vmem>>, vector<8x256xf32>
    %cst = arith.constant dense<0.000000e+00> : vector<8xf32>
    %2 = vector.multi_reduction <add>, %0, %cst [1] : vector<8x256xf32> to vector<8xf32>
    %3 = vector.shape_cast %2 : vector<8xf32> to vector<8x1xf32>
    %cst_3 = arith.constant dense<0.000000e+00> : vector<8xf32>
    %4 = vector.multi_reduction <add>, %1, %cst_3 [1] : vector<8x256xf32> to vector<8xf32>
    %5 = vector.shape_cast %4 : vector<8xf32> to vector<8x1xf32>
    %6 = arith.mulf %0, %0 : vector<8x256xf32>
    %cst_4 = arith.constant dense<0.000000e+00> : vector<8xf32>
    %7 = vector.multi_reduction <add>, %6, %cst_4 [1] : vector<8x256xf32> to vector<8xf32>
    %8 = vector.shape_cast %7 : vector<8xf32> to vector<8x1xf32>
    %9 = arith.mulf %1, %1 : vector<8x256xf32>
    %cst_5 = arith.constant dense<0.000000e+00> : vector<8xf32>
    %10 = vector.multi_reduction <add>, %9, %cst_5 [1] : vector<8x256xf32> to vector<8xf32>
    %11 = vector.shape_cast %10 : vector<8xf32> to vector<8x1xf32>
    %12 = arith.mulf %1, %0 : vector<8x256xf32>
    %cst_6 = arith.constant dense<0.000000e+00> : vector<8xf32>
    %13 = vector.multi_reduction <add>, %12, %cst_6 [1] : vector<8x256xf32> to vector<8xf32>
    %14 = vector.shape_cast %13 : vector<8xf32> to vector<8x1xf32>
    %cst_7 = arith.constant dense<0xFF800000> : vector<8xf32>
    %15 = vector.multi_reduction <maximumf>, %0, %cst_7 [1] : vector<8x256xf32> to vector<8xf32>
    %16 = vector.shape_cast %15 : vector<8xf32> to vector<8x1xf32>
    %cst_8 = arith.constant dense<0x7F800000> : vector<8xf32>
    %17 = vector.multi_reduction <minimumf>, %0, %cst_8 [1] : vector<8x256xf32> to vector<8xf32>
    %18 = vector.shape_cast %17 : vector<8xf32> to vector<8x1xf32>
    %19 = arith.subf %16, %18 : vector<8x1xf32>
    %cst_9 = arith.constant 1.000000e+00 : f32
    %20 = vector.broadcast %cst_9 : f32 to vector<8x1xf32>
    %21 = arith.divf %20, %19 : vector<8x1xf32>
    %cst_10 = arith.constant 0.000000e+00 : f32
    %22 = vector.broadcast %cst_10 : f32 to vector<8x1xf32>
    %23 = arith.subf %22, %18 : vector<8x1xf32>
    %24 = arith.mulf %23, %21 : vector<8x1xf32>
    %25 = arith.mulf %21, %3 : vector<8x1xf32>
    %cst_11 = arith.constant 2.560000e+02 : f32
    %26 = vector.broadcast %cst_11 : f32 to vector<8x1xf32>
    %27 = arith.mulf %24, %26 : vector<8x1xf32>
    %28 = arith.addf %25, %27 : vector<8x1xf32>
    %cst_12 = arith.constant 1.000000e-10 : f32
    %29 = vector.broadcast %cst_12 : f32 to vector<8x1xf32>
    %30 = arith.addf %5, %29 : vector<8x1xf32>
    %cst_13 = arith.constant 1.000000e+00 : f32
    %31 = vector.broadcast %cst_13 : f32 to vector<8x1xf32>
    %32 = arith.divf %31, %30 : vector<8x1xf32>
    %cst_14 = arith.constant 1.000000e-10 : f32
    %33 = vector.broadcast %cst_14 : f32 to vector<8x1xf32>
    %34 = arith.addf %28, %33 : vector<8x1xf32>
    %cst_15 = arith.constant 1.000000e+00 : f32
    %35 = vector.broadcast %cst_15 : f32 to vector<8x1xf32>
    %36 = arith.divf %35, %34 : vector<8x1xf32>
    %37 = arith.mulf %36, %21 : vector<8x1xf32>
    %38 = arith.mulf %36, %24 : vector<8x1xf32>
    %39 = arith.mulf %32, %5 : vector<8x1xf32>
    %40 = arith.mulf %37, %3 : vector<8x1xf32>
    %cst_16 = arith.constant 2.560000e+02 : f32
    %41 = vector.broadcast %cst_16 : f32 to vector<8x1xf32>
    %42 = arith.mulf %38, %41 : vector<8x1xf32>
    %43 = arith.addf %40, %42 : vector<8x1xf32>
    %44 = arith.mulf %37, %14 : vector<8x1xf32>
    %45 = arith.mulf %38, %5 : vector<8x1xf32>
    %46 = arith.addf %44, %45 : vector<8x1xf32>
    %47 = arith.mulf %32, %46 : vector<8x1xf32>
    %48 = arith.mulf %32, %32 : vector<8x1xf32>
    %49 = arith.mulf %48, %11 : vector<8x1xf32>
    %50 = arith.mulf %37, %37 : vector<8x1xf32>
    %51 = arith.mulf %50, %8 : vector<8x1xf32>
    %52 = arith.mulf %37, %38 : vector<8x1xf32>
    %cst_17 = arith.constant 2.000000e+00 : f32
    %53 = vector.broadcast %cst_17 : f32 to vector<8x1xf32>
    %54 = arith.mulf %53, %52 : vector<8x1xf32>
    %55 = arith.mulf %54, %3 : vector<8x1xf32>
    %56 = arith.addf %51, %55 : vector<8x1xf32>
    %57 = arith.mulf %38, %38 : vector<8x1xf32>
    %cst_18 = arith.constant 2.560000e+02 : f32
    %58 = vector.broadcast %cst_18 : f32 to vector<8x1xf32>
    %59 = arith.mulf %57, %58 : vector<8x1xf32>
    %60 = arith.addf %56, %59 : vector<8x1xf32>
    %61 = arith.mulf %39, %43 : vector<8x1xf32>
    %cst_19 = arith.constant 2.560000e+02 : f32
    %62 = vector.broadcast %cst_19 : f32 to vector<8x1xf32>
    %63 = arith.divf %61, %62 : vector<8x1xf32>
    %64 = arith.subf %47, %63 : vector<8x1xf32>
    %65 = arith.mulf %39, %39 : vector<8x1xf32>
    %cst_20 = arith.constant 2.560000e+02 : f32
    %66 = vector.broadcast %cst_20 : f32 to vector<8x1xf32>
    %67 = arith.divf %65, %66 : vector<8x1xf32>
    %68 = arith.subf %49, %67 : vector<8x1xf32>
    %69 = arith.mulf %43, %43 : vector<8x1xf32>
    %cst_21 = arith.constant 2.560000e+02 : f32
    %70 = vector.broadcast %cst_21 : f32 to vector<8x1xf32>
    %71 = arith.divf %69, %70 : vector<8x1xf32>
    %72 = arith.subf %60, %71 : vector<8x1xf32>
    %73 = arith.mulf %68, %72 : vector<8x1xf32>
    %74 = math.sqrt %73 : vector<8x1xf32>
    %75 = arith.divf %64, %74 : vector<8x1xf32>
    %c0_22 = arith.constant 0 : index
    %c0_23 = arith.constant 0 : index
    %76 = vector.load %arg3[%c0_22, %c0_23] : memref<8x1xf32, #tpu.memory_space<vmem>>, vector<8x1xf32>
    tpu.vector_store %arg3[%c0_22, %c0_23], %75 {strides = array<i32>} : memref<8x1xf32, #tpu.memory_space<vmem>>, vector<8x1xf32>,
    return
  }
  func.func @transform_0(%arg0: i32) -> (i32, i32) {
    %c0_i32 = arith.constant 0 : i32
    %c0_i32_0 = arith.constant 0 : i32
    return %arg0, %c0_i32 : i32, i32
  }
  func.func @transform_1(%arg0: i32) -> (i32, i32) {
    %c0_i32 = arith.constant 0 : i32
    %c0_i32_0 = arith.constant 0 : i32
    return %arg0, %c0_i32 : i32, i32
  }
  func.func @transform_2(%arg0: i32) -> (i32, i32) {
    %c0_i32 = arith.constant 0 : i32
    %c0_i32_0 = arith.constant 0 : i32
    return %arg0, %c0_i32 : i32, i32
  }
}

</mosaic_0001>

<bundles_post_ra>
// kernel: tpu_custom_call.1
= control target key start
LH: loop header
LB: loop body
LE: loop exit
PB: predicated region body
PF: predicated region fallthrough
CT: control target
= control target key end

     0   :  { %7 = vsyncpa [#allocation3], 0  ;;  %s233_s0 = inlined_call_operand.hbm [shape: f32[8,256], index: 0, kind: input, shape index: {}]   ;;  %s234_s1 = inlined_call_operand.hbm [shape: f32[8,256], index: 1, kind: input, shape index: {}]   ;;  %s235_s2 = inlined_call_operand.vmem [shape: f32[8,1], index: 2, kind: output, shape index: {}]  }
   0x1   :  { %8 = vsyncpa [#allocation5], 0  ;;  %s189_s9 = smov [#allocation2]   ;;  %s190_s11 = smov [#allocation4]  }
   0x2   :  { %s15_s10 = sshll.u32 %s189_s9, 4  ;;  %s25_s12 = sshll.u32 %s190_s11, 4  ;;  %s16_s10 = int_to_ptr.vmem [resolvable:$true] %s15_s10  ;;  %s26_s12 = int_to_ptr.vmem [resolvable:$true] %s25_s12 }
   0x3   :  { %s141_s15 = scalar_lea.hbm %s233_s0, 256 }
   0x4   :  { %p142_p0 = scmp.ne.s32.totalorder %s233_s0, %s141_s15  ;;  %p145_p1 = scmp.lt.u32.totalorder %s141_s15, %s233_s0 }
   0x6   :  { %p147_p2 = pnand %p145_p1, %p142_p0 }
   0x8   :  { %150 = shalt.err (!%p147_p2)
}
   0x9   :  { %s151_s20 = scalar_lea.vmem %s16_s10, 256  ;;  %p156_p4 = scmp.lt.s32.totalorder %s16_s10, %s16_s10 }
   0xa   :  { %p152_p3 = scmp.ne.s32.totalorder %s16_s10, %s151_s20  ;;  %p157_p5 = scmp.lt.s32.totalorder %s151_s20, %s151_s20 }
   0xc   :  { %p158_p6 = por %p157_p5, %p156_p4 }
   0xe   :  { %p159_p7 = pnand %p158_p6, %p152_p3 }
  0x10   :  { %162 = shalt.err (!%p159_p7)
}
  0x11   :  { %18 = dma.hbm_to_vmem [thread:$0]  %s233_s0, 256, %s16_s10, [#allocation3]  }
  0x12   :  { %s163_s25 = scalar_lea.hbm %s234_s1, 256 }
  0x13   :  { %p164_p8 = scmp.ne.s32.totalorder %s234_s1, %s163_s25  ;;  %p167_p9 = scmp.lt.u32.totalorder %s163_s25, %s234_s1 }
  0x15   :  { %p169_p10 = pnand %p167_p9, %p164_p8 }
  0x17   :  { %172 = shalt.err (!%p169_p10)
}
  0x18   :  { %s173_s30 = scalar_lea.vmem %s26_s12, 256  ;;  %p178_p12 = scmp.lt.s32.totalorder %s26_s12, %s26_s12 }
  0x19   :  { %p174_p11 = scmp.ne.s32.totalorder %s26_s12, %s173_s30  ;;  %p179_p13 = scmp.lt.s32.totalorder %s173_s30, %s173_s30 }
  0x1b   :  { %p180_p0 = por %p179_p13, %p178_p12 }
  0x1d   :  { %p181_p1 = pnand %p180_p0, %p174_p11 }
  0x1f   :  { %184 = shalt.err (!%p181_p1)
}
  0x20   :  { %28 = dma.hbm_to_vmem [thread:$0]  %s234_s1, 256, %s26_s12, [#allocation5]  }
  0x21   :  { %185 = dma.done.wait [#allocation3], 256  }
  0x22   :  { %186 = vsyncadd [#allocation3], 4294967040 }
  0x23   :  { %187 = dma.done.wait [#allocation5], 256  }
  0x24   :  { %188 = vsyncadd [#allocation5], 4294967040  ;;  %v35_v0 = vld [vmem:[#allocation2] sm:$0xff]  ;;  %v36_v1 = vld [vmem:[#allocation2 + $0x8] sm:$0xff]  ;;  %vm121_vm2 = vcmask 7168  }
  0x25   :  { %v37_v2 = vld [vmem:[#allocation4] sm:$0xff]  ;;  %v60_v3 = vmax.f32 %v35_v0, %v36_v1  ;;  %v39_v4 = vadd.f32 %v36_v1, %v35_v0  ;;  %v38_v5 = vld [vmem:[#allocation4 + $0x8] sm:$0xff]  ;;  %v63_v6 = vmin.f32 %v35_v0, %v36_v1  ;;  %v45_v10 = vmul.f32 %v35_v0, %v35_v0 }
  0x26   :  { %v42_v7 = vadd.f32 %v38_v5, %v37_v2  ;;  %v50_v8 = vmul.f32 %v37_v2, %v37_v2  ;;  %v51_v9 = vmul.f32 %v38_v5, %v38_v5  ;;  %v46_v11 = vmul.f32 %v36_v1, %v36_v1 }
  0x27   :  { %61 = vmax.xlane.f32.xlu0 %v60_v3  ;;  %40 = vadd.xlane.f32.xlu1 %v39_v4  ;;  %v55_v12 = vmul.f32 %v37_v2, %v35_v0  ;;  %v56_v15 = vmul.f32 %v38_v5, %v36_v1 }
  0x28   :  { %v52_v13 = vadd.f32 %v51_v9, %v50_v8  ;;  %v47_v14 = vadd.f32 %v46_v11, %v45_v10 }
  0x29   :  { %v57_v16 = vadd.f32 %v56_v15, %v55_v12 }
  0x2b   :  { %64 = vmin.xlane.f32.xlu0 %v63_v6  ;;  %43 = vadd.xlane.f32.xlu1 %v42_v7 }
  0x2f   :  { %53 = vadd.xlane.f32.xlu1 %v52_v13  ;;  %48 = vadd.xlane.f32.xlu0 %v47_v14 }
  0x33   :  { %58 = vadd.xlane.f32.xlu0 %v57_v16 }
  0xb4   :  { %v62_v17 = vpop.xlane.xlu0 %61  ;;  %v41_v20 = vpop.xlane.xlu1 %40 }
  0xb8   :  { %v65_v18 = vpop.xlane.xlu0 %64  ;;  %v44_v23 = vpop.xlane.xlu1 %43 }
  0xb9   :  { %v66_v19 = vsub.f32 %v62_v17, %v65_v18  ;;  %v69_v21 = vsub.f32 0.0, %v65_v18  ;;  %v74_v27 = vadd.f32 1e-10, %v44_v23 }
  0xbb   :  { %131 = vrcp.f32 %v66_v19 }
  0xbc   :  { %133 = vrcp.f32 %v74_v27  ;;  %v54_v44 = vpop.xlane.xlu1 %53  ;;  %v49_v45 = vpop.xlane.xlu0 %48 }
  0xc0   :  { %v59_v59 = vpop.xlane.xlu0 %58 }
  0xc5   :  { %v132_v22 = vpop.eup %131 }
  0xc6   :  { %v70_v24 = vmul.f32 %v132_v22, %v69_v21  ;;  %v71_v26 = vmul.f32 %v132_v22, %v41_v20  ;;  %v134_v30 = vpop.eup %133 }
  0xc7   :  { %v82_v34 = vmul.f32 %v134_v30, %v44_v23  ;;  %v90_v38 = vmul.f32 %v134_v30, %v134_v30 }
  0xc8   :  { %v72_v25 = vmul.f32 256.0, %v70_v24 }
  0xc9   :  { %v105_v42 = vmul.f32 %v82_v34, %v82_v34  ;;  %v91_v50 = vmul.f32 %v90_v38, %v54_v44 }
  0xca   :  { %v73_v28 = vadd.f32 %v72_v25, %v71_v26 }
  0xcb   :  { %v106_v49 = vmul.f32 0.00390625, %v105_v42 }
  0xcc   :  { %v77_v29 = vadd.f32 1e-10, %v73_v28 }
  0xcd   :  { %v107_v55 = vsub.f32 %v91_v50, %v106_v49 }
  0xce   :  { %135 = vrcp.f32 %v77_v29 }
  0xd8   :  { %v136_v31 = vpop.eup %135 }
  0xd9   :  { %v80_v32 = vmul.f32 %v136_v31, %v132_v22  ;;  %v81_v33 = vmul.f32 %v136_v31, %v70_v24 }
  0xdb   :  { %v83_v35 = vmul.f32 %v80_v32, %v41_v20  ;;  %v84_v36 = vmul.f32 256.0, %v81_v33  ;;  %v94_v37 = vmul.f32 %v81_v33, %v80_v32  ;;  %v92_v39 = vmul.f32 %v80_v32, %v80_v32 }
  0xdc   :  { %v98_v43 = vmul.f32 %v81_v33, %v81_v33  ;;  %v87_v63 = vmul.f32 %v81_v33, %v44_v23  ;;  %v86_v0 = vmul.f32 %v80_v32, %v59_v59 }
  0xdd   :  { %v85_v40 = vadd.f32 %v84_v36, %v83_v35  ;;  %v95_v41 = vmul.f32 2.0, %v94_v37  ;;  %v93_v48 = vmul.f32 %v92_v39, %v49_v45 }
  0xde   :  { %v99_v52 = vmul.f32 256.0, %v98_v43  ;;  %v88_v3 = vadd.f32 %v87_v63, %v86_v0 }
  0xdf   :  { %v96_v46 = vmul.f32 %v95_v41, %v41_v20  ;;  %v108_v47 = vmul.f32 %v85_v40, %v85_v40  ;;  %v101_v2 = vmul.f32 %v85_v40, %v82_v34 }
  0xe0   :  { %v89_v5 = vmul.f32 %v134_v30, %v88_v3 }
  0xe1   :  { %v97_v51 = vadd.f32 %v96_v46, %v93_v48  ;;  %v109_v53 = vmul.f32 0.00390625, %v108_v47  ;;  %v103_v4 = vmul.f32 0.00390625, %v101_v2 }
  0xe3   :  { %v100_v54 = vadd.f32 %v99_v52, %v97_v51  ;;  %v104_v6 = vsub.f32 %v89_v5, %v103_v4 }
  0xe5   :  { %v110_v56 = vsub.f32 %v100_v54, %v109_v53 }
  0xe7   :  { %v111_v57 = vmul.f32 %v110_v56, %v107_v55 }
  0xe9   :  { %137 = vrsqrt.f32 %v111_v57  ;;  %vm114_vm0 = vcmp.eq.f32.partialorder %v111_v57, inf  ;;  %v117_v61 = vand.u32 2147483648, %v111_v57  ;;  %vm116_vm1 = vcmp.eq.f32.partialorder %v111_v57, 0.0 }
  0xf3   :  { %v138_v58 = vpop.eup %137 }
  0xf4   :  { %v113_v60 = vmul.f32 %v138_v58, %v111_v57 }
  0xf6   :  { %v115_v62 = vsel %vm114_vm0, %v111_v57, %v113_v60 }
  0xf7   :  { %v118_v1 = vsel %vm116_vm1, %v117_v61, %v115_v62 }
  0xf8   :  { %139 = vrcp.f32 %v118_v1 }
 0x102   :  { %v140_v7 = vpop.eup %139 }
 0x103   :  { %v120_v8 = vmul.f32 %v140_v7, %v104_v6 }
 0x105   :  { %122 = vst.msk [vmem:[%s235_s2] sm:$0xff] %vm121_vm2, %v120_v8 }
 0x106   :  { %127 = vsyncpa [#allocation3], 1 }
 0x107   :  { %128 = vsyncpa [#allocation5], 1 }

</bundles_post_ra>
